<compile_context>
chip_gen: v7x
topology: tpu7x:2x2x1
jax: 0.10.0
libtpu: 0.0.40
codegen_flags: <defaults>
</compile_context>

<pallas_src>
import math
import jax
import jax.numpy as jnp
from jax.experimental import pallas as pl
from jax.experimental.pallas import tpu as pltpu


def _make_pe_table(n_filters: int, max_len: int) -> jnp.ndarray:
    """Deterministic sinusoidal table, same as the PyTorch __init__ buffer."""
    position = jnp.arange(0, max_len, dtype=jnp.float32)[:, None]        # (max_len, 1)
    div_term = jnp.exp(
        jnp.arange(0, n_filters, 2, dtype=jnp.float32)
        * (-(math.log(10000.0) / n_filters))
    )                                                                     # (ceil(n/2),)
    angles = position * div_term                                          # (max_len, ceil(n/2))
    pe = jnp.zeros((max_len, n_filters), dtype=jnp.float32)
    pe = pe.at[:, 0::2].set(jnp.sin(angles))
    # Guard odd n_filters (cos columns = floor(n/2)); identical to PyTorch for even n.
    pe = pe.at[:, 1::2].set(jnp.cos(angles[:, : n_filters // 2]))
    return pe


def _pe_add_kernel(x_ref, pe_ref, o_ref):
    # x_ref: (TB, L*D) tile, pe_ref: (1, L*D) row (broadcasts over TB rows).
    o_ref[...] = (x_ref[...] + pe_ref[...]).astype(o_ref.dtype)


def _pick_tb(batch: int, row_bytes: int) -> int:
    """Rows per grid step: ~4 MiB per x block, multiple of 8 sublanes when blocking."""
    SUBLANE = 8
    TARGET_BYTES = 4 << 20
    rows_fit = max(1, TARGET_BYTES // max(row_bytes, 1))
    if batch <= SUBLANE or rows_fit >= batch:
        return batch  # single full-extent block (full-dim block shapes are always legal)
    return max(SUBLANE, (min(rows_fit, batch) // SUBLANE) * SUBLANE)


def position_encoding_forward(x: jnp.ndarray, pe: jnp.ndarray) -> jnp.ndarray:
    """Forward pass: x (*, L, D) -> (*, L, D) with pe[:L] broadcast-added."""
    orig_shape = x.shape
    L, D = orig_shape[-2], orig_shape[-1]
    B = 1
    for s in orig_shape[:-2]:
        B *= s
    LD = L * D

    # Lane-dense 2-D layouts: one batch element per row.
    x2 = x.reshape(B, LD)
    pe2 = pe[:L, :].astype(x.dtype).reshape(1, LD)

    itemsize = jnp.dtype(x.dtype).itemsize
    TB = _pick_tb(B, LD * itemsize)
    grid = (pl.cdiv(B, TB),)

    out = pl.pallas_call(
        _pe_add_kernel,
        out_shape=jax.ShapeDtypeStruct((B, LD), x.dtype),
        grid_spec=pltpu.PrefetchScalarGridSpec(
            num_scalar_prefetch=0,
            grid=grid,
            in_specs=[
                pl.BlockSpec((TB, LD), lambda b: (b, 0)),
                pl.BlockSpec((1, LD), lambda b: (0, 0)),
            ],
            out_specs=pl.BlockSpec((TB, LD), lambda b: (b, 0)),
        ),
        compiler_params=pltpu.CompilerParams(
            dimension_semantics=("parallel",),
        ),
    )(x2, pe2)

    return out.reshape(orig_shape)


if __name__ == "__main__":
    n_filters = 32   # hidden size D
    max_len = 64
    pe = _make_pe_table(n_filters, max_len)

    key = jax.random.PRNGKey(0)
    # (*, L, D) with two extra leading dims, like the 4-D example in the docstring.
    x = jax.random.normal(key, (2, 3, 8, n_filters), dtype=jnp.float32)

    out = position_encoding_forward(x, pe)
    out = jax.block_until_ready(out)

    # Pure-JAX reference for correctness (f32).
    ref = x + pe[: x.shape[-2], :][None, None, :, :]
    assert out.shape == x.shape
    assert out.dtype == x.dtype
    assert jnp.allclose(out, ref, atol=1e-6, rtol=1e-6)

    # Also exercise the bf16 path (pe is cast to x.dtype inside the wrapper).
    x_bf16 = x.astype(jnp.bfloat16)
    out_bf16 = jax.block_until_ready(position_encoding_forward(x_bf16, pe))
    ref_bf16 = x_bf16 + pe[: x.shape[-2], :].astype(jnp.bfloat16)[None, None, :, :]
    assert out_bf16.dtype == jnp.bfloat16
    assert jnp.allclose(
        out_bf16.astype(jnp.float32), ref_bf16.astype(jnp.float32), atol=1e-2, rtol=1e-2
    )

    print("KERNEL_OK")
</pallas_src>

<mosaic_0001>
module attributes {stable_mosaic.version = 11 : i64} {
  func.func @_pe_add_kernel(%arg0: i32, %arg1: memref<6x256xf32, #tpu.memory_space<vmem>>, %arg2: memref<1x256xf32, #tpu.memory_space<vmem>>, %arg3: memref<6x256xf32, #tpu.memory_space<vmem>>) attributes {dimension_semantics = [#tpu.dimension_semantics<parallel>], iteration_bounds = array<i64: 1>, scalar_prefetch = 0 : i64, scratch_operands = 0 : i64, tpu.core_type = #tpu.core_type<tc>, window_params = [{transform_indices = @transform_0, window_bounds = array<i64: 6, 256>}, {pipeline_mode = #tpu.pipeline_mode<synchronous>, transform_indices = @transform_1, window_bounds = array<i64: 1, 256>}, {transform_indices = @transform_2, window_bounds = array<i64: 6, 256>}]} {
    %c0 = arith.constant 0 : index
    %c0_0 = arith.constant 0 : index
    %0 = vector.load %arg1[%c0, %c0_0] : memref<6x256xf32, #tpu.memory_space<vmem>>, vector<6x256xf32>
    %c0_1 = arith.constant 0 : index
    %c0_2 = arith.constant 0 : index
    %1 = vector.load %arg2[%c0_1, %c0_2] : memref<1x256xf32, #tpu.memory_space<vmem>>, vector<1x256xf32>
    %2 = vector.broadcast %1 : vector<1x256xf32> to vector<6x256xf32>
    %3 = arith.addf %0, %2 : vector<6x256xf32>
    %c0_3 = arith.constant 0 : index
    %c0_4 = arith.constant 0 : index
    %4 = vector.load %arg3[%c0_3, %c0_4] : memref<6x256xf32, #tpu.memory_space<vmem>>, vector<6x256xf32>
    tpu.vector_store %arg3[%c0_3, %c0_4], %3 {strides = array<i32>} : memref<6x256xf32, #tpu.memory_space<vmem>>, vector<6x256xf32>,
    return
  }
  func.func @transform_0(%arg0: i32) -> (i32, i32) {
    %c0_i32 = arith.constant 0 : i32
    %c0_i32_0 = arith.constant 0 : i32
    return %arg0, %c0_i32 : i32, i32
  }
  func.func @transform_1(%arg0: i32) -> (i32, i32) {
    %c0_i32 = arith.constant 0 : i32
    %c0_i32_0 = arith.constant 0 : i32
    %c0_i32_1 = arith.constant 0 : i32
    return %c0_i32, %c0_i32_0 : i32, i32
  }
  func.func @transform_2(%arg0: i32) -> (i32, i32) {
    %c0_i32 = arith.constant 0 : i32
    %c0_i32_0 = arith.constant 0 : i32
    return %arg0, %c0_i32 : i32, i32
  }
}

</mosaic_0001>

<bundles_post_ra>
// kernel: tpu_custom_call.1
= control target key start
LH: loop header
LB: loop body
LE: loop exit
PB: predicated region body
PF: predicated region fallthrough
CT: control target
= control target key end

     0   :  { %7 = vsyncpa [#allocation3], 0  ;;  %s151_s0 = inlined_call_operand.hbm [shape: f32[6,256], index: 0, kind: input, shape index: {}]   ;;  %s152_s1 = inlined_call_operand.vmem [shape: f32[1,256], index: 1, kind: input, shape index: {}]   ;;  %s153_s2 = inlined_call_operand.hbm [shape: f32[6,256], index: 2, kind: output, shape index: {}]  }
   0x1   :  { %8 = vsyncpa [#allocation4], 0  ;;  %s107_s9 = smov [#allocation2]   ;;  %s59_s13 = scalar_lea.hbm %s151_s0, 256 }
   0x2   :  { %s15_s10 = sshll.u32 %s107_s9, 4  ;;  %p60_p0 = scmp.ne.s32.totalorder %s151_s0, %s59_s13  ;;  %s16_s10 = int_to_ptr.vmem [resolvable:$true] %s15_s10 }
   0x3   :  { %p63_p1 = scmp.lt.u32.totalorder %s59_s13, %s151_s0 }
   0x5   :  { %p65_p2 = pnand %p63_p1, %p60_p0 }
   0x7   :  { %68 = shalt.err (!%p65_p2)
}
   0x8   :  { %s69_s18 = scalar_lea.vmem %s16_s10, 256  ;;  %p74_p4 = scmp.lt.s32.totalorder %s16_s10, %s16_s10 }
   0x9   :  { %p70_p3 = scmp.ne.s32.totalorder %s16_s10, %s69_s18  ;;  %p75_p5 = scmp.lt.s32.totalorder %s69_s18, %s69_s18 }
   0xb   :  { %p76_p6 = por %p75_p5, %p74_p4 }
   0xd   :  { %p77_p7 = pnand %p76_p6, %p70_p3 }
   0xf   :  { %80 = shalt.err (!%p77_p7)
}
  0x10   :  { %18 = dma.hbm_to_vmem [thread:$0]  %s151_s0, 256, %s16_s10, [#allocation3]  }
  0x11   :  { %103 = dma.done.wait [#allocation3], 256  }
  0x12   :  { %104 = vsyncadd [#allocation3], 4294967040  ;;  %v28_v0 = vlaneseq  ;;  %s108_s21 = smov [#allocation5]   ;;  %v24_v4 = vld [vmem:[#allocation2] sm:$0x3f] }
  0x13   :  { %s48_s22 = sshll.u32 %s108_s21, 4  ;;  %v26_v5 = vld [vmem:[%s152_s1] sm:$0x3]  ;;  %v25_v6 = vld [vmem:[#allocation2 + $0x8] sm:$0x3f]  ;;  %s49_s22 = int_to_ptr.vmem [resolvable:$true] %s48_s22 }
  0x14   :  { %v29_v1 = vshrl.u32 %v28_v0, 7  ;;  %s81_s0 = scalar_lea.vmem %s49_s22, 256  ;;  %p86_p9 = scmp.lt.s32.totalorder %s49_s22, %s49_s22 }
  0x15   :  { %p82_p8 = scmp.ne.s32.totalorder %s49_s22, %s81_s0  ;;  %p87_p10 = scmp.lt.s32.totalorder %s81_s0, %s81_s0 }
  0x16   :  { %v30_v2 = vsub.s32 0, %v29_v1  ;;  %v34_v3 = vsub.s32 1, %v29_v1 }
  0x17   :  { %p88_p11 = por %p87_p10, %p86_p9 }
  0x18   :  { %v31_v7 = vrot.slane %v26_v5, %v30_v2  ;;  %v35_v8 = vrot.slane %v26_v5, %v34_v3 }
  0x19   :  { %p89_p12 = pnand %p88_p11, %p82_p8 }
  0x1a   :  { %v38_v9 = vadd.f32 %v31_v7, %v24_v4  ;;  %v39_v10 = vadd.f32 %v35_v8, %v25_v6 }
  0x1c   :  { %40 = vst [vmem:[#allocation5] sm:$0x3f] %v38_v9  ;;  %41 = vst [vmem:[#allocation5 + $0x8] sm:$0x3f] %v39_v10 }
  0x1d   :  { %92 = shalt.err (!%p89_p12)
}
  0x1e   :  { %s93_s27 = scalar_lea.hbm %s153_s2, 256 }
  0x1f   :  { %p94_p13 = scmp.ne.s32.totalorder %s153_s2, %s93_s27  ;;  %p97_p0 = scmp.lt.u32.totalorder %s93_s27, %s153_s2 }
  0x21   :  { %p99_p1 = pnand %p97_p0, %p94_p13 }
  0x23   :  { %102 = shalt.err (!%p99_p1)
}
  0x24   :  { %51 = dma.vmem_to_hbm [thread:$0]  %s49_s22, 256, %s153_s2, [#allocation4]  }
  0x25   :  { %105 = dma.done.wait [#allocation4], 256  }
  0x26   :  { %106 = vsyncadd [#allocation4], 4294967040 }
  0x27   :  { %55 = vsyncpa [#allocation3], 1 }
  0x28   :  { %56 = vsyncpa [#allocation4], 1 }

</bundles_post_ra>
